<compile_context>
chip_gen: v6e
topology: v6e:2x2x1
jax: 0.10.0
libtpu: 0.0.40
codegen_flags: <defaults>
</compile_context>

<pallas_src>
import functools

import jax
import jax.numpy as jnp
from jax.experimental import pallas as pl
from jax.experimental.pallas import tpu as pltpu


# ----------------------------- Pallas kernel -------------------------------

def _router_kernel(*refs, activations):
    """Fused stack: h = x; for each layer: h = act(h @ W + b); store final h.

    refs = (x_ref, w0_ref, b0_ref, w1_ref, b1_ref, ..., o_ref)
    `activations` is a static tuple of per-layer activation names.
    """
    x_ref = refs[0]
    o_ref = refs[-1]
    wb_refs = refs[1:-1]

    h = x_ref[...]  # fed to the MXU in its stored dtype; accumulation is f32
    for li, act in enumerate(activations):
        w_ref = wb_refs[2 * li]
        b_ref = wb_refs[2 * li + 1]
        y = jnp.dot(h, w_ref[...], preferred_element_type=jnp.float32)  # MXU
        y = y + b_ref[...].astype(jnp.float32)                           # (1, out) broadcast
        if act == "relu":
            y = jnp.maximum(y, 0.0)
        elif act == "tanh":
            y = jnp.tanh(y)                                              # EUP, f32
        elif act == "linear":
            pass
        else:
            raise ValueError(f"Activation {act} is not supported")
        h = y                                                            # stays in VMEM/vregs (f32)

    o_ref[...] = h.astype(o_ref.dtype)


# ----------------------------- Router wrapper ------------------------------

def make_router_params(key, input_dim, hidden_dim, output_dim, num_blocks,
                       dtype=jnp.float32):
    """Deterministic parameter init mirroring the FCEncoderConfig layer stack:
       [input_dim->hidden] + num_blocks*[hidden->hidden] + [hidden->output_dim]."""
    dims = [(input_dim, hidden_dim)]
    dims += [(hidden_dim, hidden_dim)] * num_blocks
    dims += [(hidden_dim, output_dim)]
    params = []
    for (din, dout) in dims:
        key, kw, kb = jax.random.split(key, 3)
        bound = 1.0 / jnp.sqrt(din)  # PyTorch nn.Linear default uniform bound
        w = jax.random.uniform(kw, (din, dout), dtype, -bound, bound)
        b = jax.random.uniform(kb, (dout,), dtype, -bound, bound)
        params.append((w, b))
    return params


def _round_up(x, m):
    return -(-x // m) * m


def router_forward(x, params, inner_activation="relu", output_activation="linear",
                   tile_m=128):
    """x: (B, input_dim) -> (B, output_dim) through the fused FCBlock stack."""
    B, in_dim = x.shape
    n_layers = len(params)
    out_dim = params[-1][0].shape[1]
    OUT_PAD = 128  # lane-dense final HBM store

    acts = tuple(
        output_activation if i == n_layers - 1 else inner_activation
        for i in range(n_layers)
    )

    # Flatten (W, b) pairs; zero-pad the last layer to 128 output lanes so the
    # single HBM store is unmasked. Biases are passed as (1, out) 2-D tiles.
    flat_inputs = []
    for i, (w, b) in enumerate(params):
        if i == n_layers - 1 and w.shape[1] < OUT_PAD:
            w = jnp.pad(w, ((0, 0), (0, OUT_PAD - w.shape[1])))
            b = jnp.pad(b, (0, OUT_PAD - b.shape[0]))
        flat_inputs.append(w)
        flat_inputs.append(b.reshape(1, -1))
    out_cols = flat_inputs[-2].shape[1]

    # Pad batch: to a sublane multiple (8) for the single-block path, or to a
    # TILE_M multiple for the batch-tiled path.
    if B <= tile_m:
        b_pad = max(8, _round_up(B, 8))
    else:
        b_pad = _round_up(B, tile_m)
    x_p = jnp.pad(x, ((0, b_pad - B), (0, 0))) if b_pad != B else x

    kernel = functools.partial(_router_kernel, activations=acts)
    out_shape = jax.ShapeDtypeStruct((b_pad, out_cols), x.dtype)

    if b_pad <= tile_m:
        # Single block, grid-free: whole problem lives in VMEM, no pipeline
        # bookkeeping / double-buffer allocation for a 1-step grid.
        out = pl.pallas_call(
            kernel,
            out_shape=out_shape,
            in_specs=[pl.BlockSpec(memory_space=pltpu.MemorySpace.VMEM)]
                     * (1 + len(flat_inputs)),
            out_specs=pl.BlockSpec(memory_space=pltpu.MemorySpace.VMEM),
        )(x_p, *flat_inputs)
    else:
        # Batch-tiled grid: TILE_M rows per step, weights resident (constant block
        # index), batch axis "parallel" so v7x's two TensorCores split the work.
        num_tiles = b_pad // tile_m
        in_specs = [pl.BlockSpec((tile_m, in_dim), lambda i: (i, 0))]
        for arr in flat_inputs:
            in_specs.append(pl.BlockSpec(arr.shape, lambda i: (0, 0)))
        out = pl.pallas_call(
            kernel,
            out_shape=out_shape,
            grid=(num_tiles,),
            in_specs=in_specs,
            out_specs=pl.BlockSpec((tile_m, out_cols), lambda i: (i, 0)),
            compiler_params=pltpu.CompilerParams(
                dimension_semantics=("parallel",)),
        )(x_p, *flat_inputs)

    return out[:B, :out_dim]


def router_reference(x, params, inner_activation="relu", output_activation="linear"):
    """Pure-JAX reference for correctness checking."""
    n = len(params)
    for idx, (w, b) in enumerate(params):
        y = x @ w + b
        act = output_activation if idx == n - 1 else inner_activation
        if act == "relu":
            y = jnp.maximum(y, 0.0)
        elif act == "tanh":
            y = jnp.tanh(y)
        x = y
    return x


# --------------------------------- main ------------------------------------

if __name__ == "__main__":
    # FCEncoderConfig: input_dim=32, hidden_dim=64, output_dim=8 (num_route),
    # num_blocks=2, dropout=0.0, inner_activation='relu', output_activation='linear'
    batch = 2
    input_dim, hidden_dim, output_dim, num_blocks = 32, 64, 8, 2

    key = jax.random.PRNGKey(0)
    key_x, key_x2, key_p = jax.random.split(key, 3)
    x = jax.random.normal(key_x, (batch, input_dim), jnp.float32)
    params = make_router_params(key_p, input_dim, hidden_dim, output_dim, num_blocks)

    # Tiny batch: grid-free fused kernel.
    out = router_forward(x, params)
    out = jax.block_until_ready(out)
    ref = router_reference(x, params)
    assert out.shape == (batch, output_dim), out.shape
    assert jnp.allclose(out, ref, atol=1e-5, rtol=1e-5), "mismatch vs reference (small batch)"

    # Larger batch: exercises the batch-tiled "parallel" grid path.
    big_batch = 300
    x2 = jax.random.normal(key_x2, (big_batch, input_dim), jnp.float32)
    out2 = jax.block_until_ready(router_forward(x2, params))
    ref2 = router_reference(x2, params)
    assert out2.shape == (big_batch, output_dim), out2.shape
    assert jnp.allclose(out2, ref2, atol=1e-5, rtol=1e-5), "mismatch vs reference (big batch)"

    print("KERNEL_OK")
</pallas_src>

<mosaic_0001>
module attributes {stable_mosaic.version = 11 : i64} {
  func.func @_router_kernel(%arg0: memref<8x32xf32, #tpu.memory_space<vmem>>, %arg1: memref<32x64xf32, #tpu.memory_space<vmem>>, %arg2: memref<1x64xf32, #tpu.memory_space<vmem>>, %arg3: memref<64x64xf32, #tpu.memory_space<vmem>>, %arg4: memref<1x64xf32, #tpu.memory_space<vmem>>, %arg5: memref<64x64xf32, #tpu.memory_space<vmem>>, %arg6: memref<1x64xf32, #tpu.memory_space<vmem>>, %arg7: memref<64x128xf32, #tpu.memory_space<vmem>>, %arg8: memref<1x128xf32, #tpu.memory_space<vmem>>, %arg9: memref<8x128xf32, #tpu.memory_space<vmem>>) attributes {dimension_semantics = [], scalar_prefetch = 0 : i64, scratch_operands = 0 : i64, tpu.core_type = #tpu.core_type<tc>} {
    %c0 = arith.constant 0 : index
    %c0_0 = arith.constant 0 : index
    %0 = vector.load %arg0[%c0, %c0_0] : memref<8x32xf32, #tpu.memory_space<vmem>>, vector<8x32xf32>
    %c0_1 = arith.constant 0 : index
    %c0_2 = arith.constant 0 : index
    %1 = vector.load %arg1[%c0_1, %c0_2] : memref<32x64xf32, #tpu.memory_space<vmem>>, vector<32x64xf32>
    %cst = arith.constant dense<0.000000e+00> : vector<8x64xf32>
    %2 = tpu.matmul %0, %1, %cst {dimension_numbers = #tpu.dot_dimension_numbers<[1], [0], [0], [1], [0, 0, 1, 1], [], []>} : vector<8x32xf32>, vector<32x64xf32>, vector<8x64xf32> -> vector<8x64xf32>
    %c0_3 = arith.constant 0 : index
    %c0_4 = arith.constant 0 : index
    %3 = vector.load %arg2[%c0_3, %c0_4] : memref<1x64xf32, #tpu.memory_space<vmem>>, vector<1x64xf32>
    %4 = vector.broadcast %3 : vector<1x64xf32> to vector<8x64xf32>
    %5 = arith.addf %2, %4 : vector<8x64xf32>
    %cst_5 = arith.constant 0.000000e+00 : f32
    %6 = vector.broadcast %cst_5 : f32 to vector<8x64xf32>
    %7 = arith.maximumf %5, %6 : vector<8x64xf32>
    %c0_6 = arith.constant 0 : index
    %c0_7 = arith.constant 0 : index
    %8 = vector.load %arg3[%c0_6, %c0_7] : memref<64x64xf32, #tpu.memory_space<vmem>>, vector<64x64xf32>
    %cst_8 = arith.constant dense<0.000000e+00> : vector<8x64xf32>
    %9 = tpu.matmul %7, %8, %cst_8 {dimension_numbers = #tpu.dot_dimension_numbers<[1], [0], [0], [1], [0, 0, 1, 1], [], []>} : vector<8x64xf32>, vector<64x64xf32>, vector<8x64xf32> -> vector<8x64xf32>
    %c0_9 = arith.constant 0 : index
    %c0_10 = arith.constant 0 : index
    %10 = vector.load %arg4[%c0_9, %c0_10] : memref<1x64xf32, #tpu.memory_space<vmem>>, vector<1x64xf32>
    %11 = vector.broadcast %10 : vector<1x64xf32> to vector<8x64xf32>
    %12 = arith.addf %9, %11 : vector<8x64xf32>
    %cst_11 = arith.constant 0.000000e+00 : f32
    %13 = vector.broadcast %cst_11 : f32 to vector<8x64xf32>
    %14 = arith.maximumf %12, %13 : vector<8x64xf32>
    %c0_12 = arith.constant 0 : index
    %c0_13 = arith.constant 0 : index
    %15 = vector.load %arg5[%c0_12, %c0_13] : memref<64x64xf32, #tpu.memory_space<vmem>>, vector<64x64xf32>
    %cst_14 = arith.constant dense<0.000000e+00> : vector<8x64xf32>
    %16 = tpu.matmul %14, %15, %cst_14 {dimension_numbers = #tpu.dot_dimension_numbers<[1], [0], [0], [1], [0, 0, 1, 1], [], []>} : vector<8x64xf32>, vector<64x64xf32>, vector<8x64xf32> -> vector<8x64xf32>
    %c0_15 = arith.constant 0 : index
    %c0_16 = arith.constant 0 : index
    %17 = vector.load %arg6[%c0_15, %c0_16] : memref<1x64xf32, #tpu.memory_space<vmem>>, vector<1x64xf32>
    %18 = vector.broadcast %17 : vector<1x64xf32> to vector<8x64xf32>
    %19 = arith.addf %16, %18 : vector<8x64xf32>
    %cst_17 = arith.constant 0.000000e+00 : f32
    %20 = vector.broadcast %cst_17 : f32 to vector<8x64xf32>
    %21 = arith.maximumf %19, %20 : vector<8x64xf32>
    %c0_18 = arith.constant 0 : index
    %c0_19 = arith.constant 0 : index
    %22 = vector.load %arg7[%c0_18, %c0_19] : memref<64x128xf32, #tpu.memory_space<vmem>>, vector<64x128xf32>
    %cst_20 = arith.constant dense<0.000000e+00> : vector<8x128xf32>
    %23 = tpu.matmul %21, %22, %cst_20 {dimension_numbers = #tpu.dot_dimension_numbers<[1], [0], [0], [1], [0, 0, 1, 1], [], []>} : vector<8x64xf32>, vector<64x128xf32>, vector<8x128xf32> -> vector<8x128xf32>
    %c0_21 = arith.constant 0 : index
    %c0_22 = arith.constant 0 : index
    %24 = vector.load %arg8[%c0_21, %c0_22] : memref<1x128xf32, #tpu.memory_space<vmem>>, vector<1x128xf32>
    %25 = vector.broadcast %24 : vector<1x128xf32> to vector<8x128xf32>
    %26 = arith.addf %23, %25 : vector<8x128xf32>
    %c0_23 = arith.constant 0 : index
    %c0_24 = arith.constant 0 : index
    %27 = vector.load %arg9[%c0_23, %c0_24] : memref<8x128xf32, #tpu.memory_space<vmem>>, vector<8x128xf32>
    tpu.vector_store %arg9[%c0_23, %c0_24], %26 {strides = array<i32>} : memref<8x128xf32, #tpu.memory_space<vmem>>, vector<8x128xf32>,
    return
  }
}

</mosaic_0001>

<bundles_post_ra>
// kernel: tpu_custom_call.1
= control target key start
LH: loop header
LB: loop body
LE: loop exit
PB: predicated region body
PF: predicated region fallthrough
CT: control target
= control target key end

     0   :  { %14 = vsyncpa [#allocation3], 0  ;;  %s858_s0 = inlined_call_operand.hbm [shape: f32[8,32], index: 0, kind: input, shape index: {}]   ;;  %s859_s1 = inlined_call_operand.hbm [shape: f32[32,64], index: 1, kind: input, shape index: {}]   ;;  %s860_s2 = inlined_call_operand.vmem [shape: f32[1,64], index: 2, kind: input, shape index: {}]   ;;  %s861_s3 = inlined_call_operand.hbm [shape: f32[64,64], index: 3, kind: input, shape index: {}]   ;;  %s862_s4 = inlined_call_operand.vmem [shape: f32[1,64], index: 4, kind: input, shape index: {}]   ;;  %s863_s5 = inlined_call_operand.hbm [shape: f32[64,64], index: 5, kind: input, shape index: {}]   ;;  %s864_s6 = inlined_call_operand.vmem [shape: f32[1,64], index: 6, kind: input, shape index: {}]   ;;  %s865_s7 = inlined_call_operand.hbm [shape: f32[64,128], index: 7, kind: input, shape index: {}]   ;;  %s866_s8 = inlined_call_operand.vmem [shape: f32[1,128], index: 8, kind: input, shape index: {}]   ;;  %s867_s9 = inlined_call_operand.hbm [shape: f32[8,128], index: 9, kind: output, shape index: {}]  }
   0x1   :  { %15 = vsyncpa [#allocation6], 0 }
   0x2   :  { %16 = vsyncpa [#allocation9], 0 }
   0x3   :  { %17 = vsyncpa [#allocation4], 0  ;;  %s717_s30 = smov [#allocation5]  }
   0x4   :  { %s33_s10 = sshll.u32 %s717_s30, 4  ;;  %s34_s10 = int_to_ptr.vmem [resolvable:$true] %s33_s10 }
   0x5   :  { %s597_s11 = scalar_lea.vmem %s34_s10, 512  ;;  %p602_p1 = scmp.lt.s32.totalorder %s34_s10, %s34_s10 }
   0x6   :  { %p598_p0 = scmp.ne.s32.totalorder %s34_s10, %s597_s11  ;;  %p603_p2 = scmp.lt.s32.totalorder %s597_s11, %s597_s11 }
   0x8   :  { %p604_p3 = por %p603_p2, %p602_p1 }
   0xa   :  { %p605_p4 = pnand %p604_p3, %p598_p0 }
   0xc   :  { %608 = shalt.err (!%p605_p4)
}
   0xd   :  { %s718_s12 = smov 128   ;;  %s719_s13 = smov 8  }
   0xe   :  { %39 = dma.hbm_to_vmem [thread:$0]  %s859_s1, 512, %s34_s10, [#allocation6], %s718_s12, %s718_s12, %s719_s13  }
   0xf   :  { %s720_s16 = smov [#allocation8]   ;;  %s721_s18 = smov [#allocation2]  }
  0x10   :  { %s61_s17 = sshll.u32 %s720_s16, 4  ;;  %s24_s19 = sshll.u32 %s721_s18, 4  ;;  %s62_s17 = int_to_ptr.vmem [resolvable:$true] %s61_s17  ;;  %s25_s19 = int_to_ptr.vmem [resolvable:$true] %s24_s19 }
  0x11   :  { %s617_s20 = scalar_lea.vmem %s62_s17, 1024  ;;  %p622_p6 = scmp.lt.s32.totalorder %s62_s17, %s62_s17 }
  0x12   :  { %p618_p5 = scmp.ne.s32.totalorder %s62_s17, %s617_s20  ;;  %p623_p7 = scmp.lt.s32.totalorder %s617_s20, %s617_s20 }
  0x14   :  { %p624_p8 = por %p623_p7, %p622_p6 }
  0x16   :  { %p625_p9 = pnand %p624_p8, %p618_p5 }
  0x18   :  { %628 = shalt.err (!%p625_p9)
}
  0x19   :  { %67 = dma.hbm_to_vmem [thread:$0]  %s863_s5, 1024, %s62_s17, [#allocation9], %s718_s12, %s718_s12, %s719_s13  }
  0x1a   :  { %s637_s1 = scalar_lea.vmem %s25_s19, 128  ;;  %p642_p11 = scmp.lt.s32.totalorder %s25_s19, %s25_s19 }
  0x1b   :  { %p638_p10 = scmp.ne.s32.totalorder %s25_s19, %s637_s1  ;;  %p643_p12 = scmp.lt.s32.totalorder %s637_s1, %s637_s1 }
  0x1d   :  { %p644_p13 = por %p643_p12, %p642_p11 }
  0x1f   :  { %p645_p0 = pnand %p644_p13, %p638_p10 }
  0x21   :  { %648 = shalt.err (!%p645_p0)
}
  0x22   :  { %27 = dma.hbm_to_vmem [thread:$0]  %s858_s0, 128, %s25_s19, [#allocation3]  }
  0x23   :  { %s722_s25 = smov [#allocation7]   ;;  %s723_s27 = smov [#allocation10]  }
  0x24   :  { %s47_s26 = sshll.u32 %s722_s25, 4  ;;  %s75_s28 = sshll.u32 %s723_s27, 4  ;;  %s48_s26 = int_to_ptr.vmem [resolvable:$true] %s47_s26  ;;  %s76_s28 = int_to_ptr.vmem [resolvable:$true] %s75_s28 }
  0x25   :  { %s657_s29 = scalar_lea.vmem %s48_s26, 1024  ;;  %p662_p2 = scmp.lt.s32.totalorder %s48_s26, %s48_s26 }
  0x26   :  { %p658_p1 = scmp.ne.s32.totalorder %s48_s26, %s657_s29  ;;  %p663_p3 = scmp.lt.s32.totalorder %s657_s29, %s657_s29 }
  0x28   :  { %p664_p4 = por %p663_p3, %p662_p2 }
  0x2a   :  { %p665_p5 = pnand %p664_p4, %p658_p1 }
  0x2c   :  { %668 = shalt.err (!%p665_p5)
}
  0x2d   :  { %53 = dma.hbm_to_vmem [thread:$0]  %s861_s3, 1024, %s48_s26, [#allocation6], %s718_s12, %s718_s12, %s719_s13  }
  0x2e   :  { %s677_s0 = scalar_lea.vmem %s76_s28, 1024  ;;  %p682_p7 = scmp.lt.s32.totalorder %s76_s28, %s76_s28 }
  0x2f   :  { %p678_p6 = scmp.ne.s32.totalorder %s76_s28, %s677_s0  ;;  %p683_p8 = scmp.lt.s32.totalorder %s677_s0, %s677_s0 }
  0x31   :  { %p684_p9 = por %p683_p8, %p682_p7 }
  0x33   :  { %p685_p10 = pnand %p684_p9, %p678_p6 }
  0x35   :  { %688 = shalt.err (!%p685_p10)
}
  0x36   :  { %81 = dma.hbm_to_vmem [thread:$0]  %s865_s7, 1024, %s76_s28, [#allocation9], %s718_s12, %s718_s12, %s719_s13  }
  0x37   :  { %709 = dma.done.wait [#allocation3], 128  }
  0x38   :  { %710 = vsyncadd [#allocation3], 4294967168 }
  0x39   :  { %711 = dma.done.wait [#allocation6], 1536  }
  0x3a   :  { %712 = vsyncadd [#allocation6], 4294965760 }
  0x3b   :  { %713 = dma.done.wait [#allocation9], 2048  }
  0x3c   :  { %714 = vsyncadd [#allocation9], 4294965248  ;;  %v724_v0 = vmov 0.0   ;;  %vm725_vm0 = vmmov 0   ;;  %v103_v1 = vld [vmem:[#allocation5 + $0x18] sm:$0xff]  ;;  %v102_v2 = vld [vmem:[#allocation5 + $0x10] sm:$0xff] }
  0x3d   :  { %511 = vmatprep.subr.mxu0 %v724_v0  ;;  %519 = vmatprep.mubr.msk.f32.mxu0 %vm725_vm0, %v724_v0  ;;  %v193_v3 = vld [vmem:[#allocation7 + $0x38] sm:$0xff]  ;;  %v101_v4 = vld [vmem:[#allocation5 + $0x8] sm:$0xff]  ;;  %v192_v5 = vld [vmem:[#allocation7 + $0x30] sm:$0xff]  ;;  %vm111_vm1 = vcmask 261120   ;;  %vm201_vm2 = vcmask 523264   ;;  %s726_s16 = smov [#allocation11]  }
  0x3e   :  { %522 = vmatprep.subr.mxu1 %v724_v0  ;;  %538 = vmatprep.mubr.msk.f32.mxu1 %vm725_vm0, %v724_v0  ;;  %v191_v6 = vld [vmem:[#allocation7 + $0x28] sm:$0xff]  ;;  %v100_v7 = vld [vmem:[#allocation5] sm:$0xff]  ;;  %v99_v8 = vld [vmem:[#allocation2] sm:$0xff]  ;;  %s460_s17 = sshll.u32 %s726_s16, 4  ;;  %s461_s17 = int_to_ptr.vmem [resolvable:$true] %s460_s17 }
  0x3f   :  { %512 = vmatpush3.msra.mxu0 %v103_v1  ;;  %523 = vmatpush3.msra.mxu1 %v193_v3  ;;  %v190_v9 = vld [vmem:[#allocation7 + $0x20] sm:$0xff]  ;;  %v189_v10 = vld [vmem:[#allocation7 + $0x18] sm:$0xff]  ;;  %v188_v11 = vld [vmem:[#allocation7 + $0x10] sm:$0xff]  ;;  %s689_s18 = scalar_lea.vmem %s461_s17, 128  ;;  %p694_p12 = scmp.lt.s32.totalorder %s461_s17, %s461_s17 }
  0x40   :  { %513 = vmatprep.subr.mxu0 %v724_v0  ;;  %524 = vmatprep.subr.mxu1 %v724_v0  ;;  %v187_v12 = vld [vmem:[#allocation7 + $0x8] sm:$0xff]  ;;  %v186_v13 = vld [vmem:[#allocation7] sm:$0xff]  ;;  %v283_v14 = vld [vmem:[#allocation8 + $0x38] sm:$0xff]  ;;  %p690_p11 = scmp.ne.s32.totalorder %s461_s17, %s689_s18  ;;  %p695_p13 = scmp.lt.s32.totalorder %s689_s18, %s689_s18 }
  0x41   :  { %514 = vmatpush3.msra.mxu0 %v102_v2  ;;  %525 = vmatpush3.msra.mxu1 %v192_v5  ;;  %v282_v15 = vld [vmem:[#allocation8 + $0x30] sm:$0xff]  ;;  %v281_v16 = vld [vmem:[#allocation8 + $0x28] sm:$0xff]  ;;  %v280_v17 = vld [vmem:[#allocation8 + $0x20] sm:$0xff] }
  0x42   :  { %515 = vmatprep.subr.mxu0 %v724_v0  ;;  %526 = vmatprep.subr.mxu1 %v724_v0  ;;  %v279_v18 = vld [vmem:[#allocation8 + $0x18] sm:$0xff]  ;;  %v278_v24 = vld [vmem:[#allocation8 + $0x10] sm:$0xff]  ;;  %v277_v25 = vld [vmem:[#allocation8 + $0x8] sm:$0xff]  ;;  %p696_p0 = por %p695_p13, %p694_p12 }
  0x43   :  { %516 = vmatpush3.msra.mxu0 %v101_v4  ;;  %527 = vmatpush3.msra.mxu1 %v191_v6  ;;  %v471_v19 = vld [vmem:[%s860_s2] ss:$0 sm:$0xff]  ;;  %v276_v26 = vld [vmem:[#allocation8] sm:$0xff]  ;;  %v371_v28 = vld [vmem:[#allocation10 + $0x30] sm:$0xff] }
  0x44   :  { %517 = vmatprep.subr.mxu0 %v724_v0  ;;  %528 = vmatprep.subr.mxu1 %v724_v0  ;;  %v372_v27 = vld [vmem:[#allocation10 + $0x38] sm:$0xff]  ;;  %v370_v29 = vld [vmem:[#allocation10 + $0x28] sm:$0xff]  ;;  %v369_v30 = vld [vmem:[#allocation10 + $0x20] sm:$0xff]  ;;  %p697_p1 = pnand %p696_p0, %p690_p11 }
  0x45   :  { %518 = vmatpush3.msra.mxu0 %v100_v7  ;;  %529 = vmatpush3.msra.mxu1 %v190_v9  ;;  %v368_v31 = vld [vmem:[#allocation10 + $0x18] sm:$0xff]  ;;  %v367_v37 = vld [vmem:[#allocation10 + $0x10] sm:$0xff]  ;;  %v366_v38 = vld [vmem:[#allocation10 + $0x8] sm:$0xff] }
  0x46   :  { %520 = vmatmul.mubr.msk.f32.vlgmr.msra.gmra.mxu0 %vm111_vm1, %v99_v8  ;;  %530 = vmatprep.subr.mxu1 %v724_v0  ;;  %v473_v32 = vld [vmem:[%s862_s4] ss:$0 sm:$0xff]  ;;  %v365_v39 = vld [vmem:[#allocation10] sm:$0xff] }
  0x47   :  { %541 = vmatprep.subr.mxu0 %v724_v0  ;;  %531 = vmatpush3.msra.mxu1 %v189_v10  ;;  %v475_v40 = vld [vmem:[%s864_s6] ss:$0 sm:$0xff] }
  0x48   :  { %557 = vmatprep.mubr.msk.f32.mxu0 %vm725_vm0, %v724_v0  ;;  %532 = vmatprep.subr.mxu1 %v724_v0  ;;  %v477_v45 = vld [vmem:[%s866_s8] ss:$0 sm:$0xff] }
  0x49   :  { %533 = vmatpush3.msra.mxu1 %v188_v11  ;;  %542 = vmatpush3.msra.mxu0 %v283_v14 }
  0x4a   :  { %534 = vmatprep.subr.mxu1 %v724_v0  ;;  %543 = vmatprep.subr.mxu0 %v724_v0 }
  0x4b   :  { %535 = vmatpush3.msra.mxu1 %v187_v12  ;;  %544 = vmatpush3.msra.mxu0 %v282_v15 }
  0x4c   :  { %536 = vmatprep.subr.mxu1 %v724_v0  ;;  %545 = vmatprep.subr.mxu0 %v724_v0 }
  0x4d   :  { %537 = vmatpush3.msra.mxu1 %v186_v13  ;;  %546 = vmatpush3.msra.mxu0 %v281_v16 }
  0x4e   :  { %560 = vmatprep.subr.mxu1 %v724_v0  ;;  %547 = vmatprep.subr.mxu0 %v724_v0 }
  0x4f   :  { %548 = vmatpush3.msra.mxu0 %v280_v17 }
  0x50   :  { %549 = vmatprep.subr.mxu0 %v724_v0 }
  0x51   :  { %550 = vmatpush3.msra.mxu0 %v279_v18 }
  0x52   :  { %551 = vmatprep.subr.mxu0 %v724_v0 }
  0x53   :  { %552 = vmatpush3.msra.mxu0 %v278_v24 }
  0x54   :  { %553 = vmatprep.subr.mxu0 %v724_v0 }
  0x55   :  { %554 = vmatpush3.msra.mxu0 %v277_v25 }
  0x56   :  { %555 = vmatprep.subr.mxu0 %v724_v0 }
  0x57   :  { %556 = vmatpush3.msra.mxu0 %v276_v26 }
 0x106   :  { %v181_v20 = vpop.f32.mrf.mxu0 }
 0x107   :  { %v182_v21 = vadd.f32 %v471_v19, %v181_v20 }
 0x108   :  { %v521_v22 = vpop.f32.mrf.mxu0 }
 0x109   :  { %v185_v23 = vmax.f32 %v182_v21, 0.0 }
 0x10b   :  { %539 = vmatmul.mubr.msk.f32.vlgmr.msra.gmra.mxu1 %vm201_vm2, %v185_v23 }
 0x10c   :  { %576 = vmatprep.mubr.msk.f32.mxu1 %vm725_vm0, %v724_v0  ;;  %561 = vmatpush3.msra.mxu1 %v372_v27 }
 0x10d   :  { %562 = vmatprep.subr.mxu1 %v724_v0 }
 0x10e   :  { %563 = vmatpush3.msra.mxu1 %v371_v28 }
 0x10f   :  { %564 = vmatprep.subr.mxu1 %v724_v0 }
 0x110   :  { %565 = vmatpush3.msra.mxu1 %v370_v29 }
 0x111   :  { %566 = vmatprep.subr.mxu1 %v724_v0 }
 0x112   :  { %567 = vmatpush3.msra.mxu1 %v369_v30 }
 0x113   :  { %568 = vmatprep.subr.mxu1 %v724_v0 }
 0x114   :  { %569 = vmatpush3.msra.mxu1 %v368_v31 }
 0x115   :  { %570 = vmatprep.subr.mxu1 %v724_v0 }
 0x116   :  { %571 = vmatpush3.msra.mxu1 %v367_v37 }
 0x117   :  { %572 = vmatprep.subr.mxu1 %v724_v0 }
 0x118   :  { %573 = vmatpush3.msra.mxu1 %v366_v38 }
 0x119   :  { %574 = vmatprep.subr.mxu1 %v724_v0 }
 0x11a   :  { %575 = vmatpush3.msra.mxu1 %v365_v39 }
 0x1cb   :  { %v271_v33 = vpop.f32.mrf.mxu1 }
 0x1cc   :  { %v272_v34 = vadd.f32 %v473_v32, %v271_v33 }
 0x1cd   :  { %v540_v35 = vpop.f32.mrf.mxu1 }
 0x1ce   :  { %v275_v36 = vmax.f32 %v272_v34, 0.0 }
 0x1d0   :  { %558 = vmatmul.mubr.msk.f32.vlgmr.msra.gmra.mxu0 %vm201_vm2, %v275_v36 }
 0x290   :  { %v360_v41 = vpop.f32.mrf.mxu0 }
 0x291   :  { %v361_v42 = vadd.f32 %v475_v40, %v360_v41 }
 0x292   :  { %v559_v43 = vpop.f32.mrf.mxu0 }
 0x293   :  { %v364_v44 = vmax.f32 %v361_v42, 0.0 }
 0x295   :  { %577 = vmatmul.mubr.msk.f32.vlgmr.msra.gmra.mxu1 %vm201_vm2, %v364_v44 }
 0x355   :  { %v449_v46 = vpop.f32.mrf.mxu1 }
 0x356   :  { %v450_v47 = vadd.f32 %v477_v45, %v449_v46 }
 0x357   :  { %v578_v48 = vpop.f32.mrf.mxu1 }
 0x358   :  { %453 = vst [vmem:[#allocation11] sm:$0xff] %v450_v47 }
 0x359   :  { %700 = shalt.err (!%p697_p1)
}
 0x35a   :  { %463 = dma.vmem_to_hbm [thread:$0]  %s461_s17, 128, %s867_s9, [#allocation4]  }
 0x35b   :  { %715 = dma.done.wait [#allocation4], 128  }
 0x35c   :  { %716 = vsyncadd [#allocation4], 4294967168 }
 0x35d   :  { %467 = vsyncpa [#allocation3], 1 }
 0x35e   :  { %468 = vsyncpa [#allocation6], 1 }
 0x35f   :  { %469 = vsyncpa [#allocation9], 1 }
 0x360   :  { %470 = vsyncpa [#allocation4], 1 }

</bundles_post_ra>
